<compile_context>
chip_gen: v7x
topology: tpu7x:2x2x1
jax: 0.10.0
libtpu: 0.0.40
codegen_flags: <defaults>
</compile_context>

<pallas_src>
import functools

import jax
import jax.numpy as jnp
from jax import lax
from jax.experimental import pallas as pl
from jax.experimental.pallas import tpu as pltpu


def _upsample_kernel(x_ref, o_ref, *, i: int):
    """out[:, k*i] = x[:, k]; every other output column is zero.

    Implemented as an MXU matmul against a one-hot scatter matrix generated
    in-VMEM (iota + compare).  Exact in f32: each output element is either an
    exact copy of one input element or an exact zero.
    """
    tk = x_ref.shape[-1]
    tn = o_ref.shape[-1]
    row = lax.broadcasted_iota(jnp.int32, (tk, tn), 0)
    col = lax.broadcasted_iota(jnp.int32, (tk, tn), 1)
    scatter = (col == row * i).astype(x_ref.dtype)
    o_ref[...] = jnp.dot(
        x_ref[...], scatter, preferred_element_type=jnp.float32
    ).astype(o_ref.dtype)


def _pick_fold(R: int, T: int) -> int:
    """How many rows to fold into the lane dimension (lane density for small T)."""
    if T >= 128 or 128 % T != 0:
        return 1
    g = 128 // T
    # Back off so we keep at least 8 rows (full sublane / MXU-M granularity)
    # whenever the problem has that many rows to begin with.
    while g > 1 and (R % g != 0 or R // g < min(R, 8)):
        g //= 2
    return g


def _pick_row_tile(rows: int, tk: int, tn: int, itemsize: int,
                   vmem_budget: int = 8 << 20) -> int:
    """Largest power-of-two row tile under the VMEM budget.

    Per-step footprint ~= 2 * row_tile * (tk + tn) * itemsize (double-buffered
    input + output tiles).  Keeps >= 2 row blocks when possible so both v7x
    TensorCores get work on the 'parallel' row axis.
    """
    if rows <= 8:
        return rows
    cap = max(8, vmem_budget // (2 * (tk + tn) * itemsize))
    tile = 8
    while (tile * 2 <= cap and rows % (tile * 2) == 0
           and tile * 2 <= rows // 2):
        tile *= 2
    return tile


def upsample_pallas(x: jax.Array, i: int = 8) -> jax.Array:
    if i < 2:
        raise ValueError(
            "You must interpolate by at least a factor of 2, not {}".format(i))
    # TODO(synk): integer dtypes would need a non-MXU path (v7x MXU is float-only).
    B, C, IQ, T = x.shape
    R = B * C * IQ
    Tout = T * i

    # --- 2D view + lane folding (lane-dense loads/stores for small T). -------
    g = _pick_fold(R, T)
    rows = R // g
    K = g * T                 # folded input width
    N = K * i                 # folded output width
    xf = x.reshape(rows, K)

    # --- Pad row count to sublane granularity for arbitrary B*C*IQ. ----------
    rows_pad = rows if rows <= 8 else ((rows + 7) // 8) * 8
    if rows_pad != rows:
        xf = jnp.pad(xf, ((0, rows_pad - rows), (0, 0)))

    # --- Tile the time axis so the S / output tile footprint is T-independent.
    tk = 128 if K % 128 == 0 else K      # input columns per grid step
    tn = tk * i                          # output columns per grid step (x128)

    row_tile = _pick_row_tile(rows_pad, tk, tn, x.dtype.itemsize)
    grid = (rows_pad // row_tile, K // tk)

    out_fold = pl.pallas_call(
        functools.partial(_upsample_kernel, i=i),
        out_shape=jax.ShapeDtypeStruct((rows_pad, N), x.dtype),
        grid_spec=pltpu.PrefetchScalarGridSpec(
            num_scalar_prefetch=0,
            grid=grid,
            in_specs=[pl.BlockSpec((row_tile, tk), lambda r, c: (r, c))],
            out_specs=pl.BlockSpec((row_tile, tn), lambda r, c: (r, c)),
        ),
        compiler_params=pltpu.CompilerParams(
            dimension_semantics=("parallel", "parallel"),
        ),
    )(xf)

    if rows_pad != rows:
        out_fold = out_fold[:rows]
    return out_fold.reshape(B, C, IQ, Tout)


def upsample_ref(x: jax.Array, i: int) -> jax.Array:
    # Pure-JAX reference mirroring the PyTorch forward exactly.
    x5 = x[..., None]                                        # (B,C,IQ,T,1)
    mask = jnp.zeros(x5.shape[:-1] + (i,), dtype=x.dtype)
    mask = mask.at[..., 0].set(jnp.asarray(1.0, x.dtype))
    y = mask * x5                                            # (B,C,IQ,T,i)
    return y.reshape(x.shape[0], x.shape[1], x.shape[2], x.shape[3] * i)


if __name__ == "__main__":
    key = jax.random.PRNGKey(0)
    k1, k2 = jax.random.split(key)

    # B=2, C=4, IQ=2 (in-phase/quadrature), T=16, interpolation factor i=8.
    B, C, IQ, T, i = 2, 4, 2, 16, 8
    x = jax.random.normal(k1, (B, C, IQ, T), dtype=jnp.float32)
    out = jax.block_until_ready(upsample_pallas(x, i=i))
    assert out.shape == (B, C, IQ, T * i), out.shape
    assert jnp.array_equal(out, upsample_ref(x, i)), "mismatch vs reference (shape 1)"

    # Second shape: T >= 128 (no lane fold) with a multi-block, megacore-
    # shardable row grid.
    x2 = jax.random.normal(k2, (4, 8, 2, 128), dtype=jnp.float32)
    out2 = jax.block_until_ready(upsample_pallas(x2, i=4))
    assert out2.shape == (4, 8, 2, 512), out2.shape
    assert jnp.array_equal(out2, upsample_ref(x2, 4)), "mismatch vs reference (shape 2)"

    print("KERNEL_OK")
</pallas_src>

<mosaic_0001>
module attributes {stable_mosaic.version = 11 : i64} {
  func.func @_upsample_kernel(%arg0: i32, %arg1: i32, %arg2: memref<8x32xf32, #tpu.memory_space<vmem>>, %arg3: memref<8x256xf32, #tpu.memory_space<vmem>>) attributes {dimension_semantics = [#tpu.dimension_semantics<parallel>, #tpu.dimension_semantics<parallel>], iteration_bounds = array<i64: 1, 1>, scalar_prefetch = 0 : i64, scratch_operands = 0 : i64, tpu.core_type = #tpu.core_type<tc>, window_params = [{transform_indices = @transform_0, window_bounds = array<i64: 8, 32>}, {transform_indices = @transform_1, window_bounds = array<i64: 8, 256>}]} {
    %0 = tpu.iota {dimensions = array<i32: 0>} : vector<32x256xi32>
    %1 = tpu.iota {dimensions = array<i32: 1>} : vector<32x256xi32>
    %c8_i32 = arith.constant 8 : i32
    %2 = vector.broadcast %c8_i32 : i32 to vector<32x256xi32>
    %3 = arith.muli %0, %2 : vector<32x256xi32>
    %4 = arith.cmpi eq, %1, %3 : vector<32x256xi32>
    %5 = arith.extui %4 : vector<32x256xi1> to vector<32x256xi32>
    %6 = arith.sitofp %5 : vector<32x256xi32> to vector<32x256xf32>
    %c0 = arith.constant 0 : index
    %c0_0 = arith.constant 0 : index
    %7 = vector.load %arg2[%c0, %c0_0] : memref<8x32xf32, #tpu.memory_space<vmem>>, vector<8x32xf32>
    %cst = arith.constant dense<0.000000e+00> : vector<8x256xf32>
    %8 = tpu.matmul %7, %6, %cst {dimension_numbers = #tpu.dot_dimension_numbers<[1], [0], [0], [1], [0, 0, 1, 1], [], []>} : vector<8x32xf32>, vector<32x256xf32>, vector<8x256xf32> -> vector<8x256xf32>
    %c0_1 = arith.constant 0 : index
    %c0_2 = arith.constant 0 : index
    %9 = vector.load %arg3[%c0_1, %c0_2] : memref<8x256xf32, #tpu.memory_space<vmem>>, vector<8x256xf32>
    tpu.vector_store %arg3[%c0_1, %c0_2], %8 {strides = array<i32>} : memref<8x256xf32, #tpu.memory_space<vmem>>, vector<8x256xf32>,
    return
  }
  func.func @transform_0(%arg0: i32, %arg1: i32) -> (i32, i32) {
    %c0_i32 = arith.constant 0 : i32
    return %arg0, %arg1 : i32, i32
  }
  func.func @transform_1(%arg0: i32, %arg1: i32) -> (i32, i32) {
    %c0_i32 = arith.constant 0 : i32
    return %arg0, %arg1 : i32, i32
  }
}

</mosaic_0001>

<bundles_post_ra>
// kernel: tpu_custom_call.1
= control target key start
LH: loop header
LB: loop body
LE: loop exit
PB: predicated region body
PF: predicated region fallthrough
CT: control target
= control target key end

     0   :  { %6 = vsyncpa [#allocation3], 0  ;;  %s265_s0 = inlined_call_operand.hbm [shape: f32[8,32], index: 0, kind: input, shape index: {}]   ;;  %s266_s1 = inlined_call_operand.hbm [shape: f32[8,256], index: 1, kind: output, shape index: {}]  }
   0x1   :  { %7 = vsyncpa [#allocation4], 0  ;;  %s227_s6 = smov [#allocation2]   ;;  %s179_s10 = scalar_lea.hbm %s265_s0, 128 }
   0x2   :  { %s14_s7 = sshll.u32 %s227_s6, 4  ;;  %p180_p0 = scmp.ne.s32.totalorder %s265_s0, %s179_s10  ;;  %s15_s7 = int_to_ptr.vmem [resolvable:$true] %s14_s7 }
   0x3   :  { %p183_p1 = scmp.lt.u32.totalorder %s179_s10, %s265_s0 }
   0x5   :  { %p185_p2 = pnand %p183_p1, %p180_p0 }
   0x7   :  { %188 = shalt.err (!%p185_p2)
}
   0x8   :  { %s189_s15 = scalar_lea.vmem %s15_s7, 128  ;;  %p194_p4 = scmp.lt.s32.totalorder %s15_s7, %s15_s7 }
   0x9   :  { %p190_p3 = scmp.ne.s32.totalorder %s15_s7, %s189_s15  ;;  %p195_p5 = scmp.lt.s32.totalorder %s189_s15, %s189_s15 }
   0xb   :  { %p196_p6 = por %p195_p5, %p194_p4 }
   0xd   :  { %p197_p7 = pnand %p196_p6, %p190_p3 }
   0xf   :  { %200 = shalt.err (!%p197_p7)
}
  0x10   :  { %17 = dma.hbm_to_vmem [thread:$0]  %s265_s0, 128, %s15_s7, [#allocation3]  }
  0x11   :  { %223 = dma.done.wait [#allocation3], 128  }
  0x12   :  { %224 = vsyncadd [#allocation3], 4294967168  ;;  %v21_v0 = vlaneseq  ;;  %v228_v1 = vmov 0.0   ;;  %v229_v12 = vmov 1.0|1.0   ;;  %v57_v13 = vld [vmem:[#allocation2] sm:$0xff] }
  0x13   :  { %126 = vmatprep.mubr.f32.mxu0 %v228_v1  ;;  %vm58_vm12 = vcmask 261120   ;;  %s230_s0 = smov [#allocation5]  }
  0x14   :  { %v22_v2 = vshrl.u32 %v21_v0, 7  ;;  %v27_v3 = vand.u32 127, %v21_v0  ;;  %s141_s18 = sshll.u32 %s230_s0, 4  ;;  %s142_s18 = int_to_ptr.vmem [resolvable:$true] %s141_s18 }
  0x15   :  { %s201_s19 = scalar_lea.vmem %s142_s18, 256  ;;  %p206_p9 = scmp.lt.s32.totalorder %s142_s18, %s142_s18 }
  0x16   :  { %v23_v4 = vadd.s32 8, %v22_v2  ;;  %v28_v5 = vadd.s32 128, %v27_v3  ;;  %v29_v6 = vmul.u32 8, %v22_v2  ;;  %v24_v7 = vadd.s32 16, %v22_v2  ;;  %p202_p8 = scmp.ne.s32.totalorder %s142_s18, %s201_s19  ;;  %p207_p10 = scmp.lt.s32.totalorder %s201_s19, %s201_s19 }
  0x17   :  { %v25_v8 = vadd.s32 24, %v22_v2 }
  0x18   :  { %v30_v9 = vmul.u32 8, %v23_v4  ;;  %vm34_vm0 = vcmp.eq.s32.totalorder %v28_v5, %v29_v6  ;;  %v31_v10 = vmul.u32 8, %v24_v7  ;;  %vm33_vm1 = vcmp.eq.s32.totalorder %v27_v3, %v29_v6  ;;  %p208_p11 = por %p207_p10, %p206_p9 }
  0x19   :  { %v32_v11 = vmul.u32 8, %v25_v8 }
  0x1a   :  { %vm36_vm2 = vcmp.eq.s32.totalorder %v28_v5, %v30_v9  ;;  %vm35_vm3 = vcmp.eq.s32.totalorder %v27_v3, %v30_v9  ;;  %vm38_vm4 = vcmp.eq.s32.totalorder %v28_v5, %v31_v10  ;;  %vm37_vm7 = vcmp.eq.s32.totalorder %v27_v3, %v31_v10  ;;  %p209_p12 = pnand %p208_p11, %p202_p8 }
  0x1b   :  { %vm167_vm5 = vmpackc.low %vm36_vm2, %vm34_vm0  ;;  %vm40_vm6 = vcmp.eq.s32.totalorder %v28_v5, %v32_v11  ;;  %vm39_vm8 = vcmp.eq.s32.totalorder %v27_v3, %v32_v11 }
  0x1c   :  { %168 = vmatprep.subr.msk.bf16.mxu0 %vm167_vm5, %v229_v12  ;;  %vm169_vm9 = vmpackc.low %vm35_vm3, %vm33_vm1 }
  0x1d   :  { %170 = vmatpush1.bf16.msk.msra.mxu0 %vm169_vm9, %v229_v12  ;;  %vm171_vm10 = vmpackc.low %vm40_vm6, %vm38_vm4 }
  0x1e   :  { %172 = vmatprep.subr.msk.bf16.mxu0 %vm171_vm10, %v229_v12  ;;  %vm173_vm11 = vmpackc.low %vm39_vm8, %vm37_vm7 }
  0x21   :  { %174 = vmatpush1.bf16.msk.msra.mxu0 %vm173_vm11, %v229_v12 }
  0x24   :  { %166 = vmatmul.mubr.msk.f32.vlgmr.msra.gmra.mrb[0].mxu0 %vm58_vm12, %v57_v13 }
  0xf7   :  { %v128_v14 = vpop.f32.mrb[0].mxu0 }
  0xf8   :  { %133 = vst [vmem:[#allocation5] sm:$0xff] %v128_v14  ;;  %v130_v15 = vpop.f32.mrb[1].mxu0 }
  0xf9   :  { %134 = vst [vmem:[#allocation5 + $0x8] sm:$0xff] %v130_v15 }
  0xfa   :  { %212 = shalt.err (!%p209_p12)
}
  0xfb   :  { %s213_s22 = scalar_lea.hbm %s266_s1, 256 }
  0xfc   :  { %p214_p13 = scmp.ne.s32.totalorder %s266_s1, %s213_s22  ;;  %p217_p0 = scmp.lt.u32.totalorder %s213_s22, %s266_s1 }
  0xfe   :  { %p219_p1 = pnand %p217_p0, %p214_p13 }
 0x100   :  { %222 = shalt.err (!%p219_p1)
}
 0x101   :  { %144 = dma.vmem_to_hbm [thread:$0]  %s142_s18, 256, %s266_s1, [#allocation4]  }
 0x102   :  { %225 = dma.done.wait [#allocation4], 256  }
 0x103   :  { %226 = vsyncadd [#allocation4], 4294967040 }
 0x104   :  { %148 = vsyncpa [#allocation3], 1 }
 0x105   :  { %149 = vsyncpa [#allocation4], 1 }

</bundles_post_ra>
